<compile_context>
chip_gen: v7x
topology: tpu7x:2x2x1
jax: 0.10.0
libtpu: 0.0.40
codegen_flags: <defaults>
</compile_context>

<pallas_src>
import math

import jax
import jax.numpy as jnp
from jax.experimental import pallas as pl
from jax.experimental.pallas import tpu as pltpu


def _round_up(x, m):
    return (x + m - 1) // m * m


def _discriminator_kernel(ws_ref, feat_ref, out_ref):
    # ws_ref: (1, H) f32, feat_ref: (TN, H), out_ref: (TN, 1).
    # Elementwise multiply (VPU) + lane-axis reduction (XLU); f32 accumulation.
    f = feat_ref[...].astype(jnp.float32)
    w = ws_ref[...]  # already f32
    out_ref[...] = jnp.sum(f * w, axis=1, keepdims=True).astype(out_ref.dtype)


def _reference_scores(features, ws_f32):
    return jnp.matmul(features.astype(jnp.float32), ws_f32).astype(features.dtype)


def discriminator_forward(
    features,
    weight,
    summary,
    *,
    target_tile_bytes=6 * 1024 * 1024,
    min_kernel_bytes=1 * 1024 * 1024,
    force_kernel=False,
):
    """features: (N, H), weight: (H, H), summary: (H,) -> (N,)."""
    n, h = features.shape
    itemsize = features.dtype.itemsize

    # Hoisted tiny matvec (runs once per call, f32 accumulation).
    ws = jnp.matmul(weight.astype(jnp.float32), summary.astype(jnp.float32))  # (H,)

    # Small-input fast path: fixed pallas_call overhead dominates below ~1 MiB.
    if not force_kernel and n * h * itemsize < min_kernel_bytes:
        return _reference_scores(features, ws)

    # --- Tile-size selection (bytes-based) ---------------------------------
    # VMEM lays the lane (last) dim out in 128-wide registers, so a (TN, H)
    # block occupies TN * round_up(H, 128) * itemsize bytes of VMEM even
    # though only TN * H * itemsize bytes are streamed from HBM.
    vmem_row_bytes = _round_up(h, 128) * itemsize
    max_tile_vmem = 12 * 1024 * 1024          # double-buffered -> 24 MiB
    vmem_limit = 32 * 1024 * 1024             # safe on v5e / v6e / v7x
    tile_budget = min(target_tile_bytes, max_tile_vmem)
    tn = max(128, (tile_budget // vmem_row_bytes) // 128 * 128)
    tn = min(tn, _round_up(n, 128))
    if 2 * tn * vmem_row_bytes > 24 * 1024 * 1024:
        # Even a minimal 128-row tile would blow the VMEM budget (huge H):
        # fall back to plain JAX rather than risk a VMEM OOM.
        return _reference_scores(features, ws)

    num_tiles = -(-n // tn)
    ws_row = ws.reshape(1, h)  # stays f32; VMEM-resident (constant index map)

    out = pl.pallas_call(
        _discriminator_kernel,
        out_shape=jax.ShapeDtypeStruct((num_tiles * tn, 1), features.dtype),
        grid=(num_tiles,),
        in_specs=[
            pl.BlockSpec((1, h), lambda i: (0, 0)),    # ws: VMEM-resident
            pl.BlockSpec((tn, h), lambda i: (i, 0)),   # features: streamed
        ],
        out_specs=pl.BlockSpec((tn, 1), lambda i: (i, 0)),
        compiler_params=pltpu.CompilerParams(
            dimension_semantics=("parallel",),
            vmem_limit_bytes=vmem_limit,
        ),
        cost_estimate=pl.CostEstimate(
            flops=2 * n * h,
            transcendentals=0,
            bytes_accessed=n * h * itemsize + n * itemsize + h * 4,
        ),
    )(ws_row, features)

    return out.reshape(-1)[:n]


def init_discriminator_weight(key, n_hidden, dtype=jnp.float32):
    # Matches reset_parameters(): uniform(-1/sqrt(H), 1/sqrt(H)) on (H, H).
    bound = 1.0 / math.sqrt(n_hidden)
    return jax.random.uniform(
        key, (n_hidden, n_hidden), dtype=dtype, minval=-bound, maxval=bound
    )


if __name__ == "__main__":
    key = jax.random.PRNGKey(0)
    k_w, k_f, k_s, k_w2, k_f2, k_s2 = jax.random.split(key, 6)

    # Case 1: the module's natural small shapes (force the Pallas path so the
    # kernel is actually exercised despite the small-input fast path).
    n_hidden = 32
    n_nodes = 16
    weight = init_discriminator_weight(k_w, n_hidden)
    features = jax.random.normal(k_f, (n_nodes, n_hidden), dtype=jnp.float32)
    summary = jax.random.normal(k_s, (n_hidden,), dtype=jnp.float32)

    out = discriminator_forward(features, weight, summary, force_kernel=True)
    out = jax.block_until_ready(out)
    ref = features @ (weight @ summary)
    assert out.shape == (n_nodes,)
    assert jnp.allclose(out, ref, atol=1e-4, rtol=1e-4), "small-case mismatch"

    # Case 2: ragged N with several grid steps (exercises the cdiv grid and
    # the partial last features block), still small.
    n2, h2 = 1000, 256
    weight2 = init_discriminator_weight(k_w2, h2)
    features2 = jax.random.normal(k_f2, (n2, h2), dtype=jnp.float32)
    summary2 = jax.random.normal(k_s2, (h2,), dtype=jnp.float32)
    out2 = discriminator_forward(
        features2, weight2, summary2,
        target_tile_bytes=256 * 1024,   # force multiple grid steps at test size
        force_kernel=True,
    )
    out2 = jax.block_until_ready(out2)
    ref2 = features2 @ (weight2 @ summary2)
    assert out2.shape == (n2,)
    assert jnp.allclose(out2, ref2, atol=2e-3, rtol=1e-3), "ragged-case mismatch"

    print("KERNEL_OK")
</pallas_src>

<mosaic_0001>
module attributes {stable_mosaic.version = 11 : i64} {
  func.func @_discriminator_kernel(%arg0: i32, %arg1: memref<1x32xf32, #tpu.memory_space<vmem>>, %arg2: memref<128x32xf32, #tpu.memory_space<vmem>>, %arg3: memref<128x1xf32, #tpu.memory_space<vmem>>) attributes {dimension_semantics = [#tpu.dimension_semantics<parallel>], iteration_bounds = array<i64: 1>, scalar_prefetch = 0 : i64, scratch_operands = 0 : i64, tpu.core_type = #tpu.core_type<tc>, window_params = [{pipeline_mode = #tpu.pipeline_mode<synchronous>, transform_indices = @transform_0, window_bounds = array<i64: 1, 32>}, {transform_indices = @transform_1, window_bounds = array<i64: 128, 32>}, {transform_indices = @transform_2, window_bounds = array<i64: 128, 1>}]} {
    %c0 = arith.constant 0 : index
    %c0_0 = arith.constant 0 : index
    %0 = vector.load %arg2[%c0, %c0_0] : memref<128x32xf32, #tpu.memory_space<vmem>>, vector<128x32xf32>
    %c0_1 = arith.constant 0 : index
    %c0_2 = arith.constant 0 : index
    %1 = vector.load %arg1[%c0_1, %c0_2] : memref<1x32xf32, #tpu.memory_space<vmem>>, vector<1x32xf32>
    %2 = vector.broadcast %1 : vector<1x32xf32> to vector<128x32xf32>
    %3 = arith.mulf %0, %2 : vector<128x32xf32>
    %cst = arith.constant dense<0.000000e+00> : vector<128xf32>
    %4 = vector.multi_reduction <add>, %3, %cst [1] : vector<128x32xf32> to vector<128xf32>
    %5 = vector.shape_cast %4 : vector<128xf32> to vector<128x1xf32>
    %c0_3 = arith.constant 0 : index
    %c0_4 = arith.constant 0 : index
    %6 = vector.load %arg3[%c0_3, %c0_4] : memref<128x1xf32, #tpu.memory_space<vmem>>, vector<128x1xf32>
    tpu.vector_store %arg3[%c0_3, %c0_4], %5 {strides = array<i32>} : memref<128x1xf32, #tpu.memory_space<vmem>>, vector<128x1xf32>,
    return
  }
  func.func @transform_0(%arg0: i32) -> (i32, i32) {
    %c0_i32 = arith.constant 0 : i32
    %c0_i32_0 = arith.constant 0 : i32
    %c0_i32_1 = arith.constant 0 : i32
    return %c0_i32, %c0_i32_0 : i32, i32
  }
  func.func @transform_1(%arg0: i32) -> (i32, i32) {
    %c0_i32 = arith.constant 0 : i32
    %c0_i32_0 = arith.constant 0 : i32
    return %arg0, %c0_i32 : i32, i32
  }
  func.func @transform_2(%arg0: i32) -> (i32, i32) {
    %c0_i32 = arith.constant 0 : i32
    %c0_i32_0 = arith.constant 0 : i32
    return %arg0, %c0_i32 : i32, i32
  }
}

</mosaic_0001>

<bundles_post_ra>
// kernel: tpu_custom_call.1
= control target key start
LH: loop header
LB: loop body
LE: loop exit
PB: predicated region body
PF: predicated region fallthrough
CT: control target
= control target key end

     0   :  { %7 = vsyncpa [#allocation3], 0  ;;  %s324_s0 = inlined_call_operand.hbm [shape: f32[1,32], index: 0, kind: input, shape index: {}]   ;;  %s325_s1 = inlined_call_operand.hbm [shape: f32[16,32], index: 1, kind: input, shape index: {}]   ;;  %s326_s2 = inlined_call_operand.vmem [shape: f32[128,1], index: 2, kind: output, shape index: {}]  }
   0x1   :  { %8 = vsyncpa [#allocation5], 0  ;;  %s201_s9 = smov [#allocation2]   ;;  %s153_s13 = scalar_lea.hbm %s324_s0, 16 }
   0x2   :  { %s15_s10 = sshll.u32 %s201_s9, 4  ;;  %p154_p0 = scmp.ne.s32.totalorder %s324_s0, %s153_s13  ;;  %s16_s10 = int_to_ptr.vmem [resolvable:$true] %s15_s10 }
   0x3   :  { %p157_p1 = scmp.lt.u32.totalorder %s153_s13, %s324_s0 }
   0x5   :  { %p159_p2 = pnand %p157_p1, %p154_p0 }
   0x7   :  { %162 = shalt.err (!%p159_p2)
}
   0x8   :  { %s163_s18 = scalar_lea.vmem %s16_s10, 16  ;;  %s167_s19 = scalar_lea.vmem %s16_s10, 32 }
   0x9   :  { %p164_p3 = scmp.ne.s32.totalorder %s16_s10, %s163_s18  ;;  %p168_p4 = scmp.lt.s32.totalorder %s16_s10, %s16_s10 }
   0xa   :  { %p169_p5 = scmp.lt.s32.totalorder %s167_s19, %s163_s18 }
   0xc   :  { %p170_p6 = por %p169_p5, %p168_p4 }
   0xe   :  { %p171_p7 = pnand %p170_p6, %p164_p3 }
  0x10   :  { %174 = shalt.err (!%p171_p7)
}
  0x11   :  { %18 = dma.hbm_to_vmem [thread:$0]  %s324_s0, 16, %s16_s10, [#allocation3]  }
  0x12   :  { %23 = vsyncadd [#allocation5], 1792  ;;  %s202_s22 = smov [#allocation4]   ;;  %s175_s26 = scalar_lea.hbm %s325_s1, 256 }
  0x13   :  { %s24_s23 = sshll.u32 %s202_s22, 4  ;;  %p176_p8 = scmp.ne.s32.totalorder %s325_s1, %s175_s26  ;;  %s25_s23 = int_to_ptr.vmem [resolvable:$true] %s24_s23 }
  0x14   :  { %p179_p9 = scmp.lt.u32.totalorder %s175_s26, %s325_s1 }
  0x16   :  { %p181_p10 = pnand %p179_p9, %p176_p8 }
  0x18   :  { %184 = shalt.err (!%p181_p10)
}
  0x19   :  { %s185_s3 = scalar_lea.vmem %s25_s23, 256  ;;  %s189_s0 = scalar_lea.vmem %s25_s23, 2048 }
  0x1a   :  { %p186_p11 = scmp.ne.s32.totalorder %s25_s23, %s185_s3  ;;  %p190_p12 = scmp.lt.s32.totalorder %s25_s23, %s25_s23 }
  0x1b   :  { %p191_p13 = scmp.lt.s32.totalorder %s189_s0, %s185_s3 }
  0x1d   :  { %p192_p0 = por %p191_p13, %p190_p12 }
  0x1f   :  { %p193_p1 = pnand %p192_p0, %p186_p11 }
  0x21   :  { %196 = shalt.err (!%p193_p1)
}
  0x22   :  { %s203_s4 = smov 128   ;;  %s204_s5 = smov 8  }
  0x23   :  { %30 = dma.hbm_to_vmem [thread:$0]  %s325_s1, 256, %s25_s23, [#allocation5], %s203_s4, %s203_s4, %s204_s5  }
  0x24   :  { %197 = dma.done.wait [#allocation3], 16  }
  0x25   :  { %198 = vsyncadd [#allocation3], 4294967280 }
  0x26   :  { %199 = dma.done.wait [#allocation5], 2048  }
  0x27   :  { %200 = vsyncadd [#allocation5], 4294965248  ;;  %v39_v0 = vld [vmem:[#allocation4 + $0x10] sm:$0xff]  ;;  %v148_v1 = vld [vmem:[#allocation2] ss:$0 sm:$0xff]  ;;  %vm76_vm0 = vcmask 261120  }
  0x28   :  { %v37_v2 = vld [vmem:[#allocation4] sm:$0xff]  ;;  %v62_v3 = vmul.f32 %v148_v1, %v39_v0  ;;  %v40_v5 = vld [vmem:[#allocation4 + $0x18] sm:$0xff]  ;;  %v38_v6 = vld [vmem:[#allocation4 + $0x8] sm:$0xff]  ;;  %vm125_vm1 = vcmask 7168  }
  0x29   :  { %v60_v4 = vmul.f32 %v148_v1, %v37_v2  ;;  %v63_v7 = vmul.f32 %v148_v1, %v40_v5  ;;  %v61_v8 = vmul.f32 %v148_v1, %v38_v6  ;;  %v42_v9 = vld [vmem:[#allocation4 + $0x28] sm:$0xff]  ;;  %v41_v10 = vld [vmem:[#allocation4 + $0x20] sm:$0xff]  ;;  %v44_v17 = vld [vmem:[#allocation4 + $0x38] sm:$0xff] }
  0x2a   :  { %v83_v11 = vsel %vm76_vm0, %v62_v3, 0.0  ;;  %v65_v15 = vmul.f32 %v148_v1, %v42_v9  ;;  %v64_v16 = vmul.f32 %v148_v1, %v41_v10  ;;  %v43_v18 = vld [vmem:[#allocation4 + $0x30] sm:$0xff]  ;;  %v67_v21 = vmul.f32 %v148_v1, %v44_v17  ;;  %v46_v23 = vld [vmem:[#allocation4 + $0x48] sm:$0xff]  ;;  %v45_v24 = vld [vmem:[#allocation4 + $0x40] sm:$0xff] }
  0x2b   :  { %v77_v12 = vsel %vm76_vm0, %v60_v4, 0.0  ;;  %84 = vadd.xlane.f32.xlu1 %v83_v11  ;;  %v86_v13 = vsel %vm76_vm0, %v63_v7, 0.0  ;;  %v80_v14 = vsel %vm76_vm0, %v61_v8, 0.0  ;;  %v66_v22 = vmul.f32 %v148_v1, %v43_v18  ;;  %v48_v29 = vld [vmem:[#allocation4 + $0x58] sm:$0xff]  ;;  %v47_v30 = vld [vmem:[#allocation4 + $0x50] sm:$0xff]  ;;  %v50_v35 = vld [vmem:[#allocation4 + $0x68] sm:$0xff] }
  0x2c   :  { %78 = vadd.xlane.f32.xlu0 %v77_v12  ;;  %v92_v19 = vsel %vm76_vm0, %v65_v15, 0.0  ;;  %v89_v20 = vsel %vm76_vm0, %v64_v16, 0.0  ;;  %v98_v25 = vsel %vm76_vm0, %v67_v21, 0.0  ;;  %v69_v27 = vmul.f32 %v148_v1, %v46_v23  ;;  %v49_v36 = vld [vmem:[#allocation4 + $0x60] sm:$0xff]  ;;  %v52_v41 = vld [vmem:[#allocation4 + $0x78] sm:$0xff]  ;;  %v51_v42 = vld [vmem:[#allocation4 + $0x70] sm:$0xff] }
  0x2d   :  { %v95_v26 = vsel %vm76_vm0, %v66_v22, 0.0  ;;  %v68_v28 = vmul.f32 %v148_v1, %v45_v24  ;;  %v71_v33 = vmul.f32 %v148_v1, %v48_v29  ;;  %v70_v34 = vmul.f32 %v148_v1, %v47_v30 }
  0x2e   :  { %v104_v31 = vsel %vm76_vm0, %v69_v27, 0.0  ;;  %v73_v39 = vmul.f32 %v148_v1, %v50_v35  ;;  %v72_v40 = vmul.f32 %v148_v1, %v49_v36  ;;  %v75_v45 = vmul.f32 %v148_v1, %v52_v41 }
  0x2f   :  { %87 = vadd.xlane.f32.xlu1 %v86_v13  ;;  %v101_v32 = vsel %vm76_vm0, %v68_v28, 0.0  ;;  %v110_v37 = vsel %vm76_vm0, %v71_v33, 0.0  ;;  %v107_v38 = vsel %vm76_vm0, %v70_v34, 0.0  ;;  %v74_v46 = vmul.f32 %v148_v1, %v51_v42 }
  0x30   :  { %81 = vadd.xlane.f32.xlu0 %v80_v14  ;;  %v116_v43 = vsel %vm76_vm0, %v73_v39, 0.0  ;;  %v113_v44 = vsel %vm76_vm0, %v72_v40, 0.0  ;;  %v122_v47 = vsel %vm76_vm0, %v75_v45, 0.0 }
  0x31   :  { %v119_v48 = vsel %vm76_vm0, %v74_v46, 0.0 }
  0x33   :  { %93 = vadd.xlane.f32.xlu1 %v92_v19 }
  0x34   :  { %90 = vadd.xlane.f32.xlu0 %v89_v20 }
  0x37   :  { %99 = vadd.xlane.f32.xlu1 %v98_v25 }
  0x38   :  { %96 = vadd.xlane.f32.xlu0 %v95_v26 }
  0x3b   :  { %105 = vadd.xlane.f32.xlu1 %v104_v31 }
  0x3c   :  { %102 = vadd.xlane.f32.xlu0 %v101_v32 }
  0x3f   :  { %111 = vadd.xlane.f32.xlu1 %v110_v37 }
  0x40   :  { %108 = vadd.xlane.f32.xlu0 %v107_v38 }
  0x43   :  { %117 = vadd.xlane.f32.xlu1 %v116_v43 }
  0x44   :  { %114 = vadd.xlane.f32.xlu0 %v113_v44 }
  0x47   :  { %123 = vadd.xlane.f32.xlu1 %v122_v47 }
  0x48   :  { %120 = vadd.xlane.f32.xlu0 %v119_v48 }
  0xb8   :  { %v85_v49 = vpop.xlane.xlu1 %84 }
  0xb9   :  { %v79_v50 = vpop.xlane.xlu0 %78  ;;  %128 = vst.msk [vmem:[%s326_s2 + $0x10] sm:$0xff] %vm125_vm1, %v85_v49 }
  0xba   :  { %126 = vst.msk [vmem:[%s326_s2] sm:$0xff] %vm125_vm1, %v79_v50 }
  0xbc   :  { %v88_v51 = vpop.xlane.xlu1 %87 }
  0xbd   :  { %v82_v52 = vpop.xlane.xlu0 %81  ;;  %129 = vst.msk [vmem:[%s326_s2 + $0x18] sm:$0xff] %vm125_vm1, %v88_v51 }
  0xbe   :  { %127 = vst.msk [vmem:[%s326_s2 + $0x8] sm:$0xff] %vm125_vm1, %v82_v52 }
  0xc0   :  { %v94_v53 = vpop.xlane.xlu1 %93 }
  0xc1   :  { %v91_v54 = vpop.xlane.xlu0 %90  ;;  %131 = vst.msk [vmem:[%s326_s2 + $0x28] sm:$0xff] %vm125_vm1, %v94_v53 }
  0xc2   :  { %130 = vst.msk [vmem:[%s326_s2 + $0x20] sm:$0xff] %vm125_vm1, %v91_v54 }
  0xc4   :  { %v100_v55 = vpop.xlane.xlu1 %99 }
  0xc5   :  { %v97_v56 = vpop.xlane.xlu0 %96  ;;  %133 = vst.msk [vmem:[%s326_s2 + $0x38] sm:$0xff] %vm125_vm1, %v100_v55 }
  0xc6   :  { %132 = vst.msk [vmem:[%s326_s2 + $0x30] sm:$0xff] %vm125_vm1, %v97_v56 }
  0xc8   :  { %v106_v57 = vpop.xlane.xlu1 %105 }
  0xc9   :  { %v103_v58 = vpop.xlane.xlu0 %102  ;;  %135 = vst.msk [vmem:[%s326_s2 + $0x48] sm:$0xff] %vm125_vm1, %v106_v57 }
  0xca   :  { %134 = vst.msk [vmem:[%s326_s2 + $0x40] sm:$0xff] %vm125_vm1, %v103_v58 }
  0xcc   :  { %v112_v59 = vpop.xlane.xlu1 %111 }
  0xcd   :  { %v109_v60 = vpop.xlane.xlu0 %108  ;;  %137 = vst.msk [vmem:[%s326_s2 + $0x58] sm:$0xff] %vm125_vm1, %v112_v59 }
  0xce   :  { %136 = vst.msk [vmem:[%s326_s2 + $0x50] sm:$0xff] %vm125_vm1, %v109_v60 }
  0xd0   :  { %v118_v61 = vpop.xlane.xlu1 %117 }
  0xd1   :  { %v115_v62 = vpop.xlane.xlu0 %114  ;;  %139 = vst.msk [vmem:[%s326_s2 + $0x68] sm:$0xff] %vm125_vm1, %v118_v61 }
  0xd2   :  { %138 = vst.msk [vmem:[%s326_s2 + $0x60] sm:$0xff] %vm125_vm1, %v115_v62 }
  0xd4   :  { %v124_v63 = vpop.xlane.xlu1 %123 }
  0xd5   :  { %v121_v0 = vpop.xlane.xlu0 %120  ;;  %141 = vst.msk [vmem:[%s326_s2 + $0x78] sm:$0xff] %vm125_vm1, %v124_v63 }
  0xd6   :  { %140 = vst.msk [vmem:[%s326_s2 + $0x70] sm:$0xff] %vm125_vm1, %v121_v0 }
  0xd7   :  { %146 = vsyncpa [#allocation3], 1 }
  0xd8   :  { %147 = vsyncpa [#allocation5], 1 }

</bundles_post_ra>
